<compile_context>
chip_gen: v6e
topology: v6e:2x2x1
jax: 0.10.0
libtpu: 0.0.40
codegen_flags: <defaults>
</compile_context>

<pallas_src>
import functools

import jax
import jax.numpy as jnp
from jax.experimental import pallas as pl
from jax.experimental.pallas import tpu as pltpu

_LANE = 128
_TARGET_BLOCK_BYTES = 2 * 1024 * 1024   # ~2 MiB input block per grid step
_FUSED_MAX_IMG_BYTES = 4 * 1024 * 1024  # per-image slab limit for fused path
_VMEM_LIMIT = 48 * 1024 * 1024          # raise scoped VMEM, leave v7x headroom


def _channel_gate(mean, w1, b1, w2, b2):
    """Gate MLP on pooled means, kept on VPU/XLU (no 1-column MXU matmuls).

    mean: (Nb, C) f32; w1: (Cr, C); b1: (1, Cr); w2: (C, Cr); b2: (1, C).
    Returns sigmoid gate (Nb, C) f32.
    """
    h = jnp.sum(mean[:, None, :] * w1[None, :, :], axis=-1) + b1   # (Nb, Cr)
    h = jnp.maximum(h, 0.0)
    y = jnp.sum(h[:, None, :] * w2[None, :, :], axis=-1) + b2      # (Nb, C)
    return jax.nn.sigmoid(y)


def _ca_fused_kernel(x_ref, w1_ref, b1_ref, w2_ref, b2_ref, o_ref, *, inv_hw):
    # Whole (padded) image(s) per step: pool + gate + scale fused.
    xb = x_ref[...].astype(jnp.float32)                    # (Nb, C, HWp)
    mean = jnp.sum(xb, axis=-1) * inv_hw                   # (Nb, C); pads are 0
    y = _channel_gate(mean, w1_ref[...], b1_ref[...], w2_ref[...], b2_ref[...])
    o_ref[...] = (xb * y[:, :, None]).astype(o_ref.dtype)


def _ca_pool_gate_kernel(x_ref, w1_ref, b1_ref, w2_ref, b2_ref, g_ref, acc_ref,
                         *, inv_hw):
    # Tiled pass 1: accumulate channel sums over HW tiles, emit sigmoid gate.
    j = pl.program_id(1)

    @pl.when(j == 0)
    def _():
        acc_ref[...] = jnp.zeros_like(acc_ref)

    acc_ref[...] += jnp.sum(x_ref[...].astype(jnp.float32), axis=-1)  # (1, C)

    @pl.when(j == pl.num_programs(1) - 1)
    def _():
        mean = acc_ref[...] * inv_hw
        y = _channel_gate(mean, w1_ref[...], b1_ref[...], w2_ref[...],
                          b2_ref[...])
        g_ref[...] = y[:, :, None]                                    # (1,C,1)


def _ca_scale_kernel(x_ref, g_ref, o_ref):
    # Tiled pass 2: pure channel-wise rescale, lane-dense stores.
    o_ref[...] = (x_ref[...] * g_ref[...]).astype(o_ref.dtype)


def ca_layer(x, w1, b1, w2, b2, *, force_tiled=False):
    """CALayer forward. x: (N, C, H, W); w1: (C//r, C); w2: (C, C//r)."""
    N, C, H, W = x.shape
    Cr = w1.shape[0]
    HW = H * W
    dtype = x.dtype
    itemsize = jnp.dtype(dtype).itemsize

    # Lane-dense spatial axis: pad HW up to a multiple of 128.
    HWp = ((HW + _LANE - 1) // _LANE) * _LANE
    x_flat = x.reshape(N, C, HW)
    if HWp != HW:
        x_flat = jnp.pad(x_flat, ((0, 0), (0, 0), (0, HWp - HW)))

    w1f = w1.astype(jnp.float32)
    w2f = w2.astype(jnp.float32)
    b1r = b1.reshape(1, Cr).astype(jnp.float32)
    b2r = b2.reshape(1, C).astype(jnp.float32)
    inv_hw = 1.0 / float(HW)

    img_bytes = C * HWp * itemsize
    # Gate params: constant index_map -> stay resident in VMEM across steps.
    param_specs = [
        pl.BlockSpec((Cr, C), lambda *idx: (0, 0)),
        pl.BlockSpec((1, Cr), lambda *idx: (0, 0)),
        pl.BlockSpec((C, Cr), lambda *idx: (0, 0)),
        pl.BlockSpec((1, C), lambda *idx: (0, 0)),
    ]

    if not force_tiled and img_bytes <= _FUSED_MAX_IMG_BYTES:
        # ---- Fused path: whole image(s) per step, batch N to ~2 MiB blocks.
        nb = max(1, min(N, _TARGET_BLOCK_BYTES // img_bytes))
        # Keep >= 2 grid steps when possible so both v7x TensorCores get work.
        nb = max(1, min(nb, -(-N // 2)))
        n_pad = (-N) % nb
        if n_pad:
            x_flat = jnp.pad(x_flat, ((0, n_pad), (0, 0), (0, 0)))
        Np = N + n_pad

        out_flat = pl.pallas_call(
            functools.partial(_ca_fused_kernel, inv_hw=inv_hw),
            out_shape=jax.ShapeDtypeStruct((Np, C, HWp), dtype),
            grid_spec=pltpu.PrefetchScalarGridSpec(
                num_scalar_prefetch=0,
                grid=(Np // nb,),
                in_specs=[pl.BlockSpec((nb, C, HWp), lambda i: (i, 0, 0))]
                + param_specs,
                out_specs=pl.BlockSpec((nb, C, HWp), lambda i: (i, 0, 0)),
            ),
            compiler_params=pltpu.CompilerParams(
                dimension_semantics=("parallel",),
                vmem_limit_bytes=_VMEM_LIMIT),
            cost_estimate=pl.CostEstimate(
                flops=3 * N * C * HW,
                transcendentals=2 * N * C,
                bytes_accessed=2 * Np * C * HWp * itemsize),
        )(x_flat, w1f, b1r, w2f, b2r)

        return out_flat[:N, :, :HW].reshape(N, C, H, W)

    # ---- Tiled path: large images. Pass 1 pooled gate, pass 2 channel scale.
    thw = _TARGET_BLOCK_BYTES // (C * itemsize)
    thw = max(_LANE, (thw // _LANE) * _LANE)
    thw = min(thw, HWp)
    extra = (-HWp) % thw
    if extra:
        x_flat = jnp.pad(x_flat, ((0, 0), (0, 0), (0, extra)))
        HWp += extra
    n_hw = HWp // thw

    gate = pl.pallas_call(
        functools.partial(_ca_pool_gate_kernel, inv_hw=inv_hw),
        out_shape=jax.ShapeDtypeStruct((N, C, 1), jnp.float32),
        grid_spec=pltpu.PrefetchScalarGridSpec(
            num_scalar_prefetch=0,
            grid=(N, n_hw),  # reduction (HW) axis last
            in_specs=[pl.BlockSpec((1, C, thw), lambda i, j: (i, 0, j))]
            + param_specs,
            out_specs=pl.BlockSpec((1, C, 1), lambda i, j: (i, 0, 0)),
            scratch_shapes=[pltpu.VMEM((1, C), jnp.float32)],
        ),
        compiler_params=pltpu.CompilerParams(
            dimension_semantics=("parallel", "arbitrary"),
            vmem_limit_bytes=_VMEM_LIMIT),
        cost_estimate=pl.CostEstimate(
            flops=N * C * HWp,
            transcendentals=2 * N * C,
            bytes_accessed=N * C * HWp * itemsize),
    )(x_flat, w1f, b1r, w2f, b2r)

    out_flat = pl.pallas_call(
        _ca_scale_kernel,
        out_shape=jax.ShapeDtypeStruct((N, C, HWp), dtype),
        grid_spec=pltpu.PrefetchScalarGridSpec(
            num_scalar_prefetch=0,
            grid=(N, n_hw),
            in_specs=[
                pl.BlockSpec((1, C, thw), lambda i, j: (i, 0, j)),
                pl.BlockSpec((1, C, 1), lambda i, j: (i, 0, 0)),
            ],
            out_specs=pl.BlockSpec((1, C, thw), lambda i, j: (i, 0, j)),
        ),
        compiler_params=pltpu.CompilerParams(
            dimension_semantics=("parallel", "parallel"),
            vmem_limit_bytes=_VMEM_LIMIT),
        cost_estimate=pl.CostEstimate(
            flops=N * C * HWp,
            transcendentals=0,
            bytes_accessed=2 * N * C * HWp * itemsize),
    )(x_flat, gate)

    return out_flat[:, :, :HW].reshape(N, C, H, W)


def _reference(x, w1, b1, w2, b2):
    # Pure-JAX reference of the PyTorch CALayer forward.
    y = jnp.mean(x, axis=(2, 3), keepdims=True)                 # (N,C,1,1)
    y = jnp.einsum('oc,nchw->nohw', w1, y) + b1[None, :, None, None]
    y = jnp.maximum(y, 0.0)
    y = jnp.einsum('oc,nchw->nohw', w2, y) + b2[None, :, None, None]
    y = jax.nn.sigmoid(y)
    return x * y


if __name__ == "__main__":
    # Small shapes consistent with the module: channel >= reduction.
    N, C, H, W = 2, 32, 16, 16
    reduction = 16
    Cr = C // reduction  # 2

    key = jax.random.PRNGKey(0)
    kx, k1, kb1, k2, kb2 = jax.random.split(key, 5)

    x = jax.random.normal(kx, (N, C, H, W), dtype=jnp.float32)
    # 1x1 conv weights collapse to matrices.
    w1 = 0.1 * jax.random.normal(k1, (Cr, C), dtype=jnp.float32)
    b1 = 0.1 * jax.random.normal(kb1, (Cr,), dtype=jnp.float32)
    w2 = 0.1 * jax.random.normal(k2, (C, Cr), dtype=jnp.float32)
    b2 = 0.1 * jax.random.normal(kb2, (C,), dtype=jnp.float32)

    ref = _reference(x, w1, b1, w2, b2)

    out_fused = jax.block_until_ready(ca_layer(x, w1, b1, w2, b2))
    out_tiled = jax.block_until_ready(
        ca_layer(x, w1, b1, w2, b2, force_tiled=True))

    assert out_fused.shape == (N, C, H, W)
    assert jnp.allclose(out_fused, ref, atol=1e-5, rtol=1e-5)
    assert jnp.allclose(out_tiled, ref, atol=1e-5, rtol=1e-5)
    print("KERNEL_OK")
</pallas_src>

<mosaic_0001>
module attributes {stable_mosaic.version = 11 : i64} {
  func.func @_ca_fused_kernel(%arg0: i32, %arg1: memref<1x32x256xf32, #tpu.memory_space<vmem>>, %arg2: memref<2x32xf32, #tpu.memory_space<vmem>>, %arg3: memref<1x2xf32, #tpu.memory_space<vmem>>, %arg4: memref<32x2xf32, #tpu.memory_space<vmem>>, %arg5: memref<1x32xf32, #tpu.memory_space<vmem>>, %arg6: memref<1x32x256xf32, #tpu.memory_space<vmem>>) attributes {dimension_semantics = [#tpu.dimension_semantics<parallel>], iteration_bounds = array<i64: 2>, scalar_prefetch = 0 : i64, scratch_operands = 0 : i64, tpu.core_type = #tpu.core_type<tc>, window_params = [{transform_indices = @transform_0, window_bounds = array<i64: 1, 32, 256>}, {pipeline_mode = #tpu.pipeline_mode<synchronous>, transform_indices = @transform_1, window_bounds = array<i64: 2, 32>}, {pipeline_mode = #tpu.pipeline_mode<synchronous>, transform_indices = @transform_2, window_bounds = array<i64: 1, 2>}, {pipeline_mode = #tpu.pipeline_mode<synchronous>, transform_indices = @transform_3, window_bounds = array<i64: 32, 2>}, {pipeline_mode = #tpu.pipeline_mode<synchronous>, transform_indices = @transform_4, window_bounds = array<i64: 1, 32>}, {transform_indices = @transform_5, window_bounds = array<i64: 1, 32, 256>}]} {
    %c0 = arith.constant 0 : index
    %c0_0 = arith.constant 0 : index
    %c0_1 = arith.constant 0 : index
    %0 = vector.load %arg1[%c0, %c0_0, %c0_1] : memref<1x32x256xf32, #tpu.memory_space<vmem>>, vector<1x32x256xf32>
    %cst = arith.constant dense<0.000000e+00> : vector<1x32xf32>
    %1 = vector.multi_reduction <add>, %0, %cst [2] : vector<1x32x256xf32> to vector<1x32xf32>
    %cst_2 = arith.constant 3.906250e-03 : f32
    %2 = vector.broadcast %cst_2 : f32 to vector<1x32xf32>
    %3 = arith.mulf %1, %2 : vector<1x32xf32>
    %c0_3 = arith.constant 0 : index
    %c0_4 = arith.constant 0 : index
    %4 = vector.load %arg2[%c0_3, %c0_4] : memref<2x32xf32, #tpu.memory_space<vmem>>, vector<2x32xf32>
    %c0_5 = arith.constant 0 : index
    %c0_6 = arith.constant 0 : index
    %5 = vector.load %arg3[%c0_5, %c0_6] : memref<1x2xf32, #tpu.memory_space<vmem>>, vector<1x2xf32>
    %c0_7 = arith.constant 0 : index
    %c0_8 = arith.constant 0 : index
    %6 = vector.load %arg4[%c0_7, %c0_8] : memref<32x2xf32, #tpu.memory_space<vmem>>, vector<32x2xf32>
    %c0_9 = arith.constant 0 : index
    %c0_10 = arith.constant 0 : index
    %7 = vector.load %arg5[%c0_9, %c0_10] : memref<1x32xf32, #tpu.memory_space<vmem>>, vector<1x32xf32>
    %8 = vector.shape_cast %3 : vector<1x32xf32> to vector<1x1x32xf32>
    %9 = vector.shape_cast %4 : vector<2x32xf32> to vector<1x2x32xf32>
    %10 = vector.broadcast %8 : vector<1x1x32xf32> to vector<1x2x32xf32>
    %11 = arith.mulf %10, %9 : vector<1x2x32xf32>
    %cst_11 = arith.constant dense<0.000000e+00> : vector<1x2xf32>
    %12 = vector.multi_reduction <add>, %11, %cst_11 [2] : vector<1x2x32xf32> to vector<1x2xf32>
    %13 = arith.addf %12, %5 : vector<1x2xf32>
    %cst_12 = arith.constant 0.000000e+00 : f32
    %14 = vector.broadcast %cst_12 : f32 to vector<1x2xf32>
    %15 = arith.maximumf %13, %14 : vector<1x2xf32>
    %16 = vector.shape_cast %15 : vector<1x2xf32> to vector<1x1x2xf32>
    %17 = vector.shape_cast %6 : vector<32x2xf32> to vector<1x32x2xf32>
    %18 = vector.broadcast %16 : vector<1x1x2xf32> to vector<1x32x2xf32>
    %19 = arith.mulf %18, %17 : vector<1x32x2xf32>
    %cst_13 = arith.constant dense<0.000000e+00> : vector<1x32xf32>
    %20 = vector.multi_reduction <add>, %19, %cst_13 [2] : vector<1x32x2xf32> to vector<1x32xf32>
    %21 = arith.addf %20, %7 : vector<1x32xf32>
    %22 = arith.negf %21 : vector<1x32xf32>
    %23 = math.exp %22 : vector<1x32xf32>
    %cst_14 = arith.constant 1.000000e+00 : f32
    %24 = vector.broadcast %cst_14 : f32 to vector<1x32xf32>
    %25 = arith.addf %24, %23 : vector<1x32xf32>
    %26 = arith.divf %24, %25 : vector<1x32xf32>
    %27 = vector.shape_cast %26 : vector<1x32xf32> to vector<1x32x1xf32>
    %28 = vector.broadcast %27 : vector<1x32x1xf32> to vector<1x32x256xf32>
    %29 = arith.mulf %0, %28 : vector<1x32x256xf32>
    %c0_15 = arith.constant 0 : index
    %c0_16 = arith.constant 0 : index
    %c0_17 = arith.constant 0 : index
    %30 = vector.load %arg6[%c0_15, %c0_16, %c0_17] : memref<1x32x256xf32, #tpu.memory_space<vmem>>, vector<1x32x256xf32>
    tpu.vector_store %arg6[%c0_15, %c0_16, %c0_17], %29 {strides = array<i32>} : memref<1x32x256xf32, #tpu.memory_space<vmem>>, vector<1x32x256xf32>,
    return
  }
  func.func @transform_0(%arg0: i32) -> (i32, i32, i32) {
    %c0_i32 = arith.constant 0 : i32
    %c0_i32_0 = arith.constant 0 : i32
    %c0_i32_1 = arith.constant 0 : i32
    return %arg0, %c0_i32, %c0_i32_0 : i32, i32, i32
  }
  func.func @transform_1(%arg0: i32) -> (i32, i32) {
    %c0_i32 = arith.constant 0 : i32
    %c0_i32_0 = arith.constant 0 : i32
    %c0_i32_1 = arith.constant 0 : i32
    return %c0_i32, %c0_i32_0 : i32, i32
  }
  func.func @transform_2(%arg0: i32) -> (i32, i32) {
    %c0_i32 = arith.constant 0 : i32
    %c0_i32_0 = arith.constant 0 : i32
    %c0_i32_1 = arith.constant 0 : i32
    return %c0_i32, %c0_i32_0 : i32, i32
  }
  func.func @transform_3(%arg0: i32) -> (i32, i32) {
    %c0_i32 = arith.constant 0 : i32
    %c0_i32_0 = arith.constant 0 : i32
    %c0_i32_1 = arith.constant 0 : i32
    return %c0_i32, %c0_i32_0 : i32, i32
  }
  func.func @transform_4(%arg0: i32) -> (i32, i32) {
    %c0_i32 = arith.constant 0 : i32
    %c0_i32_0 = arith.constant 0 : i32
    %c0_i32_1 = arith.constant 0 : i32
    return %c0_i32, %c0_i32_0 : i32, i32
  }
  func.func @transform_5(%arg0: i32) -> (i32, i32, i32) {
    %c0_i32 = arith.constant 0 : i32
    %c0_i32_0 = arith.constant 0 : i32
    %c0_i32_1 = arith.constant 0 : i32
    return %arg0, %c0_i32, %c0_i32_0 : i32, i32, i32
  }
}

</mosaic_0001>

<bundles_post_ra>
// kernel: tpu_custom_call.1
= control target key start
LH: loop header
LB: loop body
LE: loop exit
PB: predicated region body
PF: predicated region fallthrough
CT: control target
= control target key end

     0   :  { %10 = vsyncpa [#allocation3], 0  ;;  %s1807_s0 = inlined_call_operand.hbm [shape: f32[2,32,256], index: 0, kind: input, shape index: {}]   ;;  %s1808_s1 = inlined_call_operand.vmem [shape: f32[2,32], index: 1, kind: input, shape index: {}]   ;;  %s1809_s2 = inlined_call_operand.vmem [shape: f32[1,2], index: 2, kind: input, shape index: {}]   ;;  %s1810_s3 = inlined_call_operand.vmem [shape: f32[32,2], index: 3, kind: input, shape index: {}]   ;;  %s1811_s4 = inlined_call_operand.vmem [shape: f32[1,32], index: 4, kind: input, shape index: {}]   ;;  %s1812_s5 = inlined_call_operand.hbm [shape: f32[2,32,256], index: 5, kind: output, shape index: {}]  }
   0x1   :  { %12 = vsyncpa [#allocation3 + $0x1], 0 }
   0x2   :  { %13 = vsyncpa [#allocation4], 0 }
   0x3   :  { %15 = vsyncpa [#allocation4 + $0x1], 0  ;;  %s1421_s18 = smov 0   ;;  %s1423_s19 = smov 0  }
   0x4   :  { %s1425_s20 = smov 0   ;;  %s1427_s21 = smov 0  }
   0x5 LB: > { %s1442_s22 = sadd.s32 4294967295, %s1382_s21   ;;  %s1199_s23 = sadd.s32 4294967294, %s1382_s21   ;;  %s1382_s21 = sphi %s1427_s21, %s1827_s21   ;;  %s1378_s20 = sphi %s1425_s20, %s1826_s20   ;;  %s1374_s19 = sphi %s1423_s19, %s1825_s19   ;;  %s1370_s18 = sphi %s1421_s18, %s1824_s18  }
   0x6   : > { %s1446_s24 = sadd.s32 1, %s1382_s21   ;;  %s28_s25 = sadd.s32 1, %s1378_s20 }
   0x7   : > { %s25_s26 = ssub.s32 %s1382_s21, %s1446_s24  ;;  %p35_p0 = scmp.ne.s32.totalorder %s1378_s20, %s1374_s19 }
   0x8   : > { %p26_p1 = scmp.eq.s32.totalorder %s25_s26, 0  ;;  %p36_p2 = scmp.eq.s32.totalorder %s1382_s21, 0 }
   0x9   : > { %p41_p3 = scmp.ne.s32.totalorder %s1374_s19, %s1370_s18  ;;  %p42_p4 = scmp.eq.s32.totalorder %s1442_s22, 0 }
   0xa   : > { %s1458_s27 = scalar_select %p26_p1, %s1378_s20, %s28_s25  }
   0xb   : > { %p1460_p5 = por %p36_p2, %p35_p0  ;;  %p1464_p6 = por %p42_p4, %p41_p3 }
   0xc   : > { %p149_p7 = scmp.eq.s32.totalorder %s1442_s22, 1  ;;  %p155_p8 = scmp.eq.s32.totalorder %s1199_s23, 1 }
   0xd   : > { %s1816_s29 = scalar_select %p1464_p6, 1, 0 }
   0xe   : > { %p1233_p10 = scmp.lt.s32.totalorder %s1382_s21, 2  ;;  %p1471_p11 = por %p149_p7, %p35_p0 }
   0xf   : > { %p1475_p12 = por %p155_p8, %p41_p3  ;;  %s187_s7 = sand.u32 1, %s1378_s20  }
  0x10   : > { %s1817_s30 = scalar_select %p1471_p11, 1, 0 }
  0x11   : > { %s1818_s6 = scalar_select %p1475_p12, 1, 0 }
  0x12   : > { %s1219_s8 = sshll.u32 %s1382_s21, 10  ;;  %s1202_s9 = sshll.u32 %s187_s7, 6 }
  0x13   : > { %s1484_s12 = scalar_lea.hbm %s1807_s0, %s1219_s8  ;;  %s191_s13 = scalar_lea.vmem [#allocation2], %s1202_s9 }
  0x14   : > { %s198_s14 = sshll.u32 %s191_s13, 4  ;;  %p1488_p13 = pnand %p1233_p10, %p1460_p5  ;;  %s1492_s14 = int_to_ptr.vmem [resolvable:$true] %s198_s14 }
  0x15   : > { %s1494_s16 = scalar_lea.sflag [#allocation3], %s187_s7  ;;  %s1290_s17 = scalar_lea.hbm %s1484_s12, 1024 }
  0x16   : > { %p1291_p0 = scmp.ne.s32.totalorder %s1484_s12, %s1290_s17  ;;  %p1292_p1 = pneg %p1488_p13 }
  0x17   : > { %s1295_s26 = scalar_lea.hbm %s1807_s0, 2048  ;;  %p1296_p4 = scmp.lt.s32.totalorder %s1484_s12, %s1807_s0 }
  0x18   : > { %p1293_p2 = pnand %p1292_p1, %p1291_p0  ;;  %p1297_p5 = scmp.lt.s32.totalorder %s1295_s26, %s1290_s17 }
  0x1a   : > { %p1294_p3 = pneg %p1293_p2  ;;  %p1298_p7 = por %p1297_p5, %p1296_p4 }
  0x1c   : > { %p1299_p8 = pnand %p1298_p7, %p1294_p3 }
  0x1e   : > { %1302 = shalt.err (!%p1299_p8)
}
  0x1f   : > { %s1303_s7 = scalar_lea.vmem %s1492_s14, 1024  ;;  %s1384_s9 = smov [#allocation2]  }
  0x20   : > { %p1304_p10 = scmp.ne.s32.totalorder %s1492_s14, %s1303_s7  ;;  %s1308_s10 = sshll.u32 %s1384_s9, 4  ;;  %s1309_s10 = int_to_ptr.vmem [resolvable:$false] %s1308_s10 }
  0x21   : > { %s1310_s11 = scalar_lea.vmem %s1309_s10, 2048  ;;  %p1311_p2 = scmp.lt.s32.totalorder %s1492_s14, %s1309_s10 }
  0x22   : > { %p1306_p9 = pnand %p1304_p10, %p1292_p1  ;;  %p1312_p12 = scmp.lt.s32.totalorder %s1310_s11, %s1303_s7 }
  0x24   : > { %p1307_p0 = pneg %p1306_p9  ;;  %p1313_p11 = por %p1312_p12, %p1311_p2 }
  0x26   : > { %p1314_p6 = pnand %p1313_p11, %p1307_p0 }
  0x28   : > { %1317 = shalt.err (!%p1314_p6)
}
  0x29   : > { %s1385_s13 = smov 256   ;;  %s1386_s17 = smov 16  }
  0x2a   : > { %1228 = dma.hbm_to_vmem [thread:$0]  (!%p1488_p13), %s1484_s12, 1024, %s1492_s14, %s1494_s16, %s1385_s13, %s1385_s13, %s1386_s17  }
  0x2b   : > { %p1205_p9 = scmp.ge.s32.totalorder %s1382_s21, 1  ;;  %p206_p1 = scmp.lt.s32.totalorder %s1382_s21, 3 }
  0x2d   : > { %p207_p3 = pnand %p1205_p9, %p206_p1 }
  0x2e   : > { %s1518_s23 = sand.u32 (!%p207_p3), 1, %s1374_s19   ;;  %p1820_p6 = scmp.ne.s32.totalorder (!%p207_p3), %s1816_s29, 0 }
  0x2f   : > { %210 = sbr.rel (%p207_p3) target bundleno = 998 (0x3e6), region = 40  ;;  %s1206_s25 = sshll.u32 (!%p207_p3), %s1518_s23, 6 }
  0x30   : > { %s213_s26 = scalar_lea.sflag (!%p207_p3), [#allocation3], %s1518_s23  ;;  %s216_s28 = scalar_lea.vmem (!%p207_p3), [#allocation2], %s1206_s25 }
  0x34   : > { %1361 = dma.done.wait (%p1820_p6), %s213_s26, 1024  }
  0x35   : > { %1363 = vsyncadd (%p1820_p6), %s213_s26, 4294966272  ;;  %v1528_v0 = vld [vmem:[%s216_s28 + $0x20] sm:$0xff]  ;;  %v1530_v1 = vld [vmem:[%s216_s28 + $0x28] sm:$0xff]  ;;  %v275_v12 = vlaneseq  ;;  %v1387_v18 = vmov 0   ;;  %vm372_vm0 = vcmask 130112   ;;  %vm379_vm1 = vcmask 195712  }
  0x36   : > { %v1532_v2 = vld [vmem:[%s216_s28] sm:$0xff]  ;;  %v257_v3 = vadd.f32 %v1530_v1, %v1528_v0  ;;  %v1536_v4 = vld [vmem:[%s216_s28 + $0x8] sm:$0xff]  ;;  %v1538_v5 = vld [vmem:[%s216_s28 + $0x30] sm:$0xff]  ;;  %1273 = vset.pattern.permute.xlu1 %v1387_v18  ;;  %1272 = vset.pattern.permute.xlu0 %v1387_v18  ;;  %vm386_vm2 = vcmask 261312   ;;  %vm407_vm3 = vcmask 1041409   ;;  %vm410_vm4 = vcmask 254976  }
  0x37   : > { %v1540_v6 = vld [vmem:[%s216_s28 + $0x38] sm:$0xff]  ;;  %v251_v7 = vadd.f32 %v1536_v4, %v1532_v2  ;;  %v1544_v8 = vld [vmem:[%s216_s28 + $0x10] sm:$0xff]  ;;  %v1553_v13 = vshrl.u32 %v275_v12, 7  ;;  %v267_v15 = vld [vmem:[%s1808_s1] sm:$0x3]  ;;  %vm974_vm5 = vcmask 1042434  }
  0x38   : > { %v1546_v9 = vld [vmem:[%s216_s28 + $0x18] sm:$0xff]  ;;  %258 = vadd.xlane.f32.xlu1 %v257_v3  ;;  %v260_v10 = vadd.f32 %v1540_v6, %v1538_v5  ;;  %v1208_v20 = vld [vmem:[%s1809_s2] ss:$0 sm:$0xff]  ;;  %v271_v48 = vld [vmem:[%s1810_s3 + $0x10] sm:$0xff]  ;;  %vm976_vm6 = vcmask 1043459   ;;  %vm978_vm7 = vcmask 1044484  }
  0x39   : > { %252 = vadd.xlane.f32.xlu0 %v251_v7  ;;  %v254_v11 = vadd.f32 %v1546_v9, %v1544_v8  ;;  %v1556_v14 = vsub.s32 0, %v1553_v13  ;;  %v1563_v17 = vsub.s32 1, %v1553_v13  ;;  %v445_v40 = vsub.s32 2, %v1553_v13  ;;  %v269_v42 = vld [vmem:[%s1810_s3] sm:$0xff]  ;;  %v270_v55 = vld [vmem:[%s1810_s3 + $0x8] sm:$0xff]  ;;  %s242_s29 = scalar_lea.vmem [#allocation5], %s1206_s25 }
  0x3a   : > { %v452_v46 = vsub.s32 3, %v1553_v13  ;;  %v459_v51 = vsub.s32 4, %v1553_v13  ;;  %v466_v57 = vsub.s32 5, %v1553_v13  ;;  %v473_v62 = vsub.s32 6, %v1553_v13  ;;  %s1126_s12 = sshll.u32 %s242_s29, 4  ;;  %s1220_s14 = sshll.u32 %s1442_s22, 10  ;;  %s1755_s12 = int_to_ptr.vmem [resolvable:$true] %s1126_s12 }
  0x3b   : > { %v278_v16 = vrot.slane %v267_v15, %v1556_v14  ;;  %v297_v19 = vrot.slane %v267_v15, %v1563_v17  ;;  %v446_v45 = vrot.slane %v269_v42, %v445_v40  ;;  %v432_v52 = vrot.slane %v269_v42, %v1556_v14  ;;  %s1762_s16 = scalar_lea.hbm %s1812_s5, %s1220_s14  ;;  %s1113_s22 = scalar_lea.sflag [#allocation4], %s1518_s23 }
  0x3c   : > { %261 = vadd.xlane.f32.xlu1 %v260_v10  ;;  %v565_v50 = vrot.slane %v271_v48, %v452_v46  ;;  %v460_v53 = vrot.slane %v269_v42, %v459_v51  ;;  %v439_v54 = vrot.slane %v269_v42, %v1563_v17  ;;  %v572_v56 = vrot.slane %v271_v48, %v459_v51  ;;  %v272_v10 = vld [vmem:[%s1810_s3 + $0x18] sm:$0xff]  ;;  %s1318_s8 = scalar_lea.vmem %s1755_s12, 1024  ;;  %p1821_p12 = scmp.ne.s32.totalorder %s1817_s30, 0 }
  0x3d   : > { %255 = vadd.xlane.f32.xlu0 %v254_v11  ;;  %v488_v58 = vrot.slane %v270_v55, %v1556_v14  ;;  %v467_v59 = vrot.slane %v269_v42, %v466_v57  ;;  %v495_v60 = vrot.slane %v270_v55, %v1563_v17  ;;  %v579_v61 = vrot.slane %v271_v48, %v466_v57  ;;  %p1319_p11 = scmp.ne.s32.totalorder %s1755_s12, %s1318_s8  ;;  %s1388_s7 = smov [#allocation5]  }
  0x3e   : > { %v544_v63 = vrot.slane %v271_v48, %v1556_v14  ;;  %v474_v3 = vrot.slane %v269_v42, %v473_v62  ;;  %v551_v7 = vrot.slane %v271_v48, %v1563_v17  ;;  %v586_v11 = vrot.slane %v271_v48, %v473_v62  ;;  %s1322_s9 = sshll.u32 %s1388_s7, 4  ;;  %s1323_s9 = int_to_ptr.vmem [resolvable:$false] %s1322_s9 }
  0x3f   : > { %v480_v15 = vsub.s32 7, %v1553_v13  ;;  %vm980_vm8 = vcmask 1045509   ;;  %vm982_vm9 = vcmask 1046534   ;;  %vm984_vm10 = vcmask 1047559   ;;  %p1320_p13 = pnand %p1319_p11, %p1821_p12  ;;  %s1324_s10 = scalar_lea.vmem %s1323_s9, 2048 }
  0x40   : > { %vm1011_vm11 = vcmask 15360   ;;  %p1325_p5 = scmp.lt.s32.totalorder %s1755_s12, %s1323_s9  ;;  %p1326_p7 = scmp.lt.s32.totalorder %s1324_s10, %s1318_s8 }
  0x41   : > { %v481_v18 = vrot.slane %v269_v42, %v480_v15  ;;  %p1321_p4 = pneg %p1320_p13 }
  0x42   : > { %p1327_p8 = por %p1326_p7, %p1325_p5 }
  0x44   : > { %p1328_p10 = pnand %p1327_p8, %p1321_p4 }
  0x4d   : > { %284 = vbcast.lane.b32.xlu1 %v278_v16, 264 }
  0x51   : > { %299 = vbcast.lane.b32.xlu1 %v297_v19, 256 }
  0x53   : > { %280 = vbcast.lane.b32.xlu0 %v278_v16, 256 }
  0x55   : > { %303 = vbcast.lane.b32.xlu1 %v297_v19, 264 }
  0x57   : > { %288 = vbcast.lane.b32.xlu0 %v278_v16, 272 }
  0x59   : > { %307 = vbcast.lane.b32.xlu1 %v297_v19, 272 }
  0x5b   : > { %292 = vbcast.lane.b32.xlu0 %v278_v16, 280  ;;  %v600_v16 = vrot.slane %v272_v10, %v1556_v14  ;;  %v621_v14 = vrot.slane %v272_v10, %v452_v46 }
  0x5d   : > { %311 = vbcast.lane.b32.xlu1 %v297_v19, 280  ;;  %v607_v19 = vrot.slane %v272_v10, %v1563_v17  ;;  %v523_v17 = vrot.slane %v270_v55, %v466_v57 }
  0x5f   : > { %420 = vbcast.lane.b32.xlu0 %v1208_v20, 256  ;;  %v593_v20 = vrot.slane %v271_v48, %v480_v15 }
  0xc1   : > { %v259_v21 = vpop.xlane.xlu1 %258 }
  0xc2   : > { %v253_v22 = vpop.xlane.xlu0 %252  ;;  %v265_v34 = vmul.f32 0.00390625, %v259_v21  ;;  %v502_v21 = vrot.slane %v270_v55, %v445_v40 }
  0xc3   : > { %v263_v26 = vmul.f32 0.00390625, %v253_v22  ;;  %v558_v22 = vrot.slane %v271_v48, %v445_v40 }
  0xc5   : > { %v262_v23 = vpop.xlane.xlu1 %261 }
  0xc6   : > { %v256_v24 = vpop.xlane.xlu0 %255  ;;  %v266_v39 = vmul.f32 0.00390625, %v262_v23  ;;  %v614_v23 = vrot.slane %v272_v10, %v445_v40 }
  0xc7   : > { %v264_v25 = vmul.f32 0.00390625, %v256_v24  ;;  %v453_v24 = vrot.slane %v269_v42, %v452_v46 }
  0xc9   : > { %v285_v27 = vpop.permute.xlu1 %284 }
  0xca   : > { %v322_v28 = vmul.f32 %v285_v27, %v264_v25  ;;  %v281_v29 = vpop.permute.xlu0 %280  ;;  %v628_v27 = vrot.slane %v272_v10, %v459_v51 }
  0xcb   : > { %v321_v30 = vmul.f32 %v281_v29, %v263_v26  ;;  %v530_v29 = vrot.slane %v270_v55, %v473_v62 }
  0xcc   : > { %341 = vperm.xlu1 %1273, %v322_v28   ;;  %v635_v28 = vrot.slane %v272_v10, %v466_v57 }
  0xcd   : > { %338 = vperm.xlu0 %1272, %v321_v30   ;;  %v300_v31 = vpop.permute.xlu1 %299  ;;  %v642_v30 = vrot.slane %v272_v10, %v473_v62 }
  0xce   : > { %v325_v32 = vmul.f32 %v300_v31, %v263_v26  ;;  %v289_v33 = vpop.permute.xlu0 %288  ;;  %v516_v26 = vrot.slane %v270_v55, %v459_v51  ;;  %v537_v31 = vrot.slane %v270_v55, %v480_v15 }
  0xcf   : > { %v323_v36 = vmul.f32 %v289_v33, %v265_v34 }
  0xd0   : > { %350 = vperm.xlu1 %1273, %v325_v32   ;;  %v649_v32 = vrot.slane %v272_v10, %v480_v15 }
  0xd1   : > { %v304_v35 = vpop.permute.xlu1 %303 }
  0xd2   : > { %v326_v37 = vmul.f32 %v304_v35, %v264_v25  ;;  %v293_v38 = vpop.permute.xlu0 %292  ;;  %v509_v25 = vrot.slane %v270_v55, %v452_v46  ;;  %v362_v35 = vand.u32 127, %v275_v12 }
  0xd3   : > { %v324_v43 = vmul.f32 %v293_v38, %v266_v39 }
  0xd4   : > { %353 = vperm.xlu0 %1272, %v326_v37   ;;  %344 = vperm.xlu1 %1273, %v323_v36   ;;  %v367_v38 = vadd.s32 4294967288, %v362_v35  ;;  %v381_v40 = vadd.s32 4294967272, %v362_v35 }
  0xd5   : > { %v308_v41 = vpop.permute.xlu1 %307 }
  0xd6   : > { %v327_v44 = vmul.f32 %v308_v41, %v265_v34  ;;  %v421_v33 = vpop.permute.xlu0 %420  ;;  %v384_v46 = vsub.s32 %v381_v40, %v1553_v13 }
  0xd8   : > { %356 = vperm.xlu0 %1272, %v327_v44   ;;  %347 = vperm.xlu1 %1273, %v324_v43   ;;  %v1597_v43 = vsub.s32 %v362_v35, %v1553_v13  ;;  %v370_v44 = vsub.s32 %v367_v38, %v1553_v13 }
  0xd9   : > { %v312_v47 = vpop.permute.xlu1 %311 }
  0xda   : > { %v328_v49 = vmul.f32 %v312_v47, %v266_v39  ;;  %v374_v39 = vadd.s32 4294967280, %v362_v35 }
  0xdc   : > { %359 = vperm.xlu0 %1272, %v328_v49   ;;  %448 = vbcast.lane.b32.xlu1 %v446_v45, 256  ;;  %v377_v45 = vsub.s32 %v374_v39, %v1553_v13 }
  0xe0   : > { %567 = vbcast.lane.b32.xlu1 %v565_v50, 256  ;;  %434 = vbcast.lane.b32.xlu0 %v432_v52, 256 }
  0xe4   : > { %462 = vbcast.lane.b32.xlu1 %v460_v53, 256  ;;  %441 = vbcast.lane.b32.xlu0 %v439_v54, 256 }
  0xe8   : > { %574 = vbcast.lane.b32.xlu1 %v572_v56, 256  ;;  %490 = vbcast.lane.b32.xlu0 %v488_v58, 256 }
  0xec   : > { %469 = vbcast.lane.b32.xlu1 %v467_v59, 256  ;;  %497 = vbcast.lane.b32.xlu0 %v495_v60, 256 }
  0xf0   : > { %581 = vbcast.lane.b32.xlu1 %v579_v61, 256  ;;  %546 = vbcast.lane.b32.xlu0 %v544_v63, 256 }
  0xf4   : > { %476 = vbcast.lane.b32.xlu1 %v474_v3, 256  ;;  %553 = vbcast.lane.b32.xlu0 %v551_v7, 256 }
  0xf8   : > { %588 = vbcast.lane.b32.xlu1 %v586_v11, 256  ;;  %602 = vbcast.lane.b32.xlu0 %v600_v16, 256 }
  0xfc   : > { %483 = vbcast.lane.b32.xlu1 %v481_v18, 256  ;;  %609 = vbcast.lane.b32.xlu0 %v607_v19, 256 }
 0x100   : > { %595 = vbcast.lane.b32.xlu1 %v593_v20, 256  ;;  %504 = vbcast.lane.b32.xlu0 %v502_v21, 256 }
 0x104   : > { %560 = vbcast.lane.b32.xlu0 %v558_v22, 256 }
 0x108   : > { %616 = vbcast.lane.b32.xlu0 %v614_v23, 256 }
 0x10c   : > { %455 = vbcast.lane.b32.xlu0 %v453_v24, 256 }
 0x110   : > { %511 = vbcast.lane.b32.xlu0 %v509_v25, 256 }
 0x114   : > { %623 = vbcast.lane.b32.xlu0 %v621_v14, 256 }
 0x118   : > { %518 = vbcast.lane.b32.xlu0 %v516_v26, 256 }
 0x11c   : > { %630 = vbcast.lane.b32.xlu0 %v628_v27, 256 }
 0x120   : > { %525 = vbcast.lane.b32.xlu0 %v523_v17, 256 }
 0x124   : > { %637 = vbcast.lane.b32.xlu0 %v635_v28, 256 }
 0x128   : > { %532 = vbcast.lane.b32.xlu0 %v530_v29, 256 }
 0x12c   : > { %644 = vbcast.lane.b32.xlu0 %v642_v30, 256 }
 0x130   : > { %539 = vbcast.lane.b32.xlu0 %v537_v31, 256 }
 0x134   : > { %651 = vbcast.lane.b32.xlu0 %v649_v32, 256 }
 0x147   : > { %v342_v34 = vpop.permute.xlu1 %341 }
 0x148   : > { %v339_v36 = vpop.permute.xlu0 %338  ;;  %v371_v49 = vrot.slane %v342_v34, %v370_v44 }
 0x149   : > { %v366_v12 = vrot.slane %v339_v36, %v1597_v43 }
 0x14b   : > { %v351_v37 = vpop.permute.xlu1 %350  ;;  %v373_v56 = vsel %vm372_vm0, %v371_v49, %v366_v12 }
 0x14c   : > { %v391_v53 = vrot.slane %v351_v37, %v1597_v43 }
 0x14f   : > { %v345_v41 = vpop.permute.xlu1 %344  ;;  %v354_v42 = vpop.permute.xlu0 %353 }
 0x150   : > { %v395_v50 = vrot.slane %v354_v42, %v370_v44  ;;  %v378_v51 = vrot.slane %v345_v41, %v377_v45 }
 0x152   : > { %v396_v57 = vsel %vm372_vm0, %v395_v50, %v391_v53  ;;  %v380_v13 = vsel %vm379_vm1, %v378_v51, %v373_v56 }
 0x153   : > { %v348_v47 = vpop.permute.xlu1 %347  ;;  %v357_v48 = vpop.permute.xlu0 %356 }
 0x154   : > { %v400_v52 = vrot.slane %v357_v48, %v377_v45  ;;  %v385_v54 = vrot.slane %v348_v47, %v384_v46 }
 0x156   : > { %v401_v59 = vsel %vm379_vm1, %v400_v52, %v396_v57  ;;  %v387_v60 = vsel %vm386_vm2, %v385_v54, %v380_v13 }
 0x157   : > { %v360_v55 = vpop.permute.xlu0 %359  ;;  %v449_v7 = vpop.permute.xlu1 %448 }
 0x158   : > { %v405_v58 = vrot.slane %v360_v55, %v384_v46 }
 0x15a   : > { %v406_v61 = vsel %vm386_vm2, %v405_v58, %v401_v59 }
 0x15b   : > { %v408_v62 = vsel %vm407_vm3, %v406_v61, %v387_v60  ;;  %v435_v3 = vpop.permute.xlu0 %434  ;;  %v568_v11 = vpop.permute.xlu1 %567 }
 0x15c   : > { %v411_v63 = vsel %vm410_vm4, %v408_v62, 0.0 }
 0x15d   : > { %412 = vadd.xlane.f32.xlu1 %v411_v63 }
 0x15f   : > { %v442_v10 = vpop.permute.xlu0 %441  ;;  %v463_v16 = vpop.permute.xlu1 %462 }
 0x163   : > { %v491_v15 = vpop.permute.xlu0 %490  ;;  %v575_v19 = vpop.permute.xlu1 %574 }
 0x167   : > { %v498_v18 = vpop.permute.xlu0 %497  ;;  %v1605_v21 = vpop.permute.xlu1 %469 }
 0x16b   : > { %v547_v20 = vpop.permute.xlu0 %546  ;;  %v1607_v23 = vpop.permute.xlu1 %581 }
 0x16f   : > { %v554_v22 = vpop.permute.xlu0 %553  ;;  %v1609_v25 = vpop.permute.xlu1 %476 }
 0x173   : > { %v603_v24 = vpop.permute.xlu0 %602  ;;  %v1611_v26 = vpop.permute.xlu1 %588 }
 0x177   : > { %v610_v14 = vpop.permute.xlu0 %609  ;;  %v1613_v17 = vpop.permute.xlu1 %483 }
 0x17b   : > { %v505_v27 = vpop.permute.xlu0 %504  ;;  %v1615_v29 = vpop.permute.xlu1 %595 }
 0x17f   : > { %v561_v28 = vpop.permute.xlu0 %560 }
 0x183   : > { %v617_v30 = vpop.permute.xlu0 %616 }
 0x187   : > { %v456_v34 = vpop.permute.xlu0 %455 }
 0x18b   : > { %v512_v38 = vpop.permute.xlu0 %511 }
 0x18f   : > { %v624_v42 = vpop.permute.xlu0 %623 }
 0x193   : > { %v519_v46 = vpop.permute.xlu0 %518 }
 0x197   : > { %v631_v50 = vpop.permute.xlu0 %630 }
 0x19b   : > { %v526_v53 = vpop.permute.xlu0 %525 }
 0x19f   : > { %v638_v58 = vpop.permute.xlu0 %637 }
 0x1a3   : > { %v533_v60 = vpop.permute.xlu0 %532 }
 0x1e6   : > { %v413_v31 = vpop.xlane.xlu1 %412 }
 0x1e7   : > { %v423_v32 = vadd.f32 %v421_v33, %v413_v31 }
 0x1e9   : > { %v1617_v35 = vmax.f32 %v423_v32, 0.0 }
 0x1eb   : > { %v685_v36 = vmul.f32 %v435_v3, %v1617_v35  ;;  %v686_v37 = vmul.f32 %v442_v10, %v1617_v35  ;;  %v693_v39 = vmul.f32 %v491_v15, %v1617_v35  ;;  %v694_v40 = vmul.f32 %v498_v18, %v1617_v35 }
 0x1ec   : > { %v701_v41 = vmul.f32 %v547_v20, %v1617_v35  ;;  %v702_v33 = vmul.f32 %v554_v22, %v1617_v35  ;;  %v709_v44 = vmul.f32 %v603_v24, %v1617_v35  ;;  %v710_v45 = vmul.f32 %v610_v14, %v1617_v35  ;;  %v1660_v24 = vld [vmem:[%s1811_s4] ss:$0 sm:$0xff] }
 0x1ed   : > { %750 = vperm.xlu1 %1273, %v685_v36   ;;  %753 = vperm.xlu0 %1272, %v686_v37   ;;  %v687_v47 = vmul.f32 %v449_v7, %v1617_v35  ;;  %v695_v48 = vmul.f32 %v505_v27, %v1617_v35  ;;  %v703_v49 = vmul.f32 %v561_v28, %v1617_v35  ;;  %v645_v7 = vpop.permute.xlu0 %644 }
 0x1ee   : > { %v711_v12 = vmul.f32 %v617_v30, %v1617_v35  ;;  %v688_v51 = vmul.f32 %v456_v34, %v1617_v35  ;;  %v696_v52 = vmul.f32 %v512_v38, %v1617_v35  ;;  %v704_v54 = vmul.f32 %v568_v11, %v1617_v35 }
 0x1ef   : > { %v712_v55 = vmul.f32 %v624_v42, %v1617_v35  ;;  %v689_v56 = vmul.f32 %v463_v16, %v1617_v35  ;;  %v697_v57 = vmul.f32 %v519_v46, %v1617_v35  ;;  %v705_v13 = vmul.f32 %v575_v19, %v1617_v35 }
 0x1f0   : > { %v713_v59 = vmul.f32 %v631_v50, %v1617_v35  ;;  %v690_v61 = vmul.f32 %v1605_v21, %v1617_v35  ;;  %v698_v62 = vmul.f32 %v526_v53, %v1617_v35  ;;  %v706_v63 = vmul.f32 %v1607_v23, %v1617_v35 }
 0x1f1   : > { %774 = vperm.xlu1 %1273, %v693_v39   ;;  %777 = vperm.xlu0 %1272, %v694_v40   ;;  %v714_v3 = vmul.f32 %v638_v58, %v1617_v35  ;;  %v691_v10 = vmul.f32 %v1609_v25, %v1617_v35  ;;  %v699_v11 = vmul.f32 %v533_v60, %v1617_v35  ;;  %v540_v16 = vpop.permute.xlu0 %539 }
 0x1f2   : > { %v707_v15 = vmul.f32 %v1611_v26, %v1617_v35  ;;  %v715_v18 = vmul.f32 %v645_v7, %v1617_v35  ;;  %v692_v19 = vmul.f32 %v1613_v17, %v1617_v35  ;;  %v700_v20 = vmul.f32 %v540_v16, %v1617_v35 }
 0x1f3   : > { %v708_v22 = vmul.f32 %v1615_v29, %v1617_v35 }
 0x1f5   : > { %798 = vperm.xlu1 %1273, %v701_v41   ;;  %801 = vperm.xlu0 %1272, %v702_v33   ;;  %v652_v21 = vpop.permute.xlu0 %651 }
 0x1f6   : > { %v716_v23 = vmul.f32 %v652_v21, %v1617_v35 }
 0x1f9   : > { %822 = vperm.xlu1 %1273, %v709_v44   ;;  %825 = vperm.xlu0 %1272, %v710_v45  }
 0x1fd   : > { %756 = vperm.xlu1 %1273, %v687_v47   ;;  %780 = vperm.xlu0 %1272, %v695_v48  }
 0x201   : > { %804 = vperm.xlu1 %1273, %v703_v49   ;;  %828 = vperm.xlu0 %1272, %v711_v12  }
 0x205   : > { %759 = vperm.xlu1 %1273, %v688_v51   ;;  %783 = vperm.xlu0 %1272, %v696_v52  }
 0x209   : > { %807 = vperm.xlu1 %1273, %v704_v54   ;;  %831 = vperm.xlu0 %1272, %v712_v55  }
 0x20d   : > { %762 = vperm.xlu1 %1273, %v689_v56   ;;  %786 = vperm.xlu0 %1272, %v697_v57  }
 0x211   : > { %810 = vperm.xlu1 %1273, %v705_v13   ;;  %834 = vperm.xlu0 %1272, %v713_v59  }
 0x215   : > { %765 = vperm.xlu1 %1273, %v690_v61   ;;  %789 = vperm.xlu0 %1272, %v698_v62  }
 0x219   : > { %813 = vperm.xlu1 %1273, %v706_v63   ;;  %837 = vperm.xlu0 %1272, %v714_v3  }
 0x21d   : > { %768 = vperm.xlu1 %1273, %v691_v10   ;;  %792 = vperm.xlu0 %1272, %v699_v11  }
 0x221   : > { %816 = vperm.xlu1 %1273, %v707_v15   ;;  %840 = vperm.xlu0 %1272, %v715_v18  }
 0x225   : > { %771 = vperm.xlu1 %1273, %v692_v19   ;;  %795 = vperm.xlu0 %1272, %v700_v20  }
 0x229   : > { %819 = vperm.xlu1 %1273, %v708_v22   ;;  %843 = vperm.xlu0 %1272, %v716_v23  }
 0x22d   : > { %1034 = vbcast.lane.b32.xlu1 %v1660_v24, 264  ;;  %1030 = vbcast.lane.b32.xlu0 %v1660_v24, 256 }
 0x268   : > { %v751_v25 = vpop.permute.xlu1 %750  ;;  %v754_v14 = vpop.permute.xlu0 %753 }
 0x269   : > { %v848_v48 = vrot.slane %v751_v25, %v1597_v43  ;;  %v852_v49 = vrot.slane %v754_v14, %v1597_v43 }
 0x26b   : > { %v973_v61 = vsel %vm407_vm3, %v852_v49, %v848_v48 }
 0x26c   : > { %v775_v26 = vpop.permute.xlu1 %774  ;;  %v778_v27 = vpop.permute.xlu0 %777 }
 0x26d   : > { %v880_v12 = vrot.slane %v775_v26, %v1597_v43  ;;  %v884_v50 = vrot.slane %v778_v27, %v1597_v43 }
 0x26f   : > { %v986_v62 = vsel %vm407_vm3, %v884_v50, %v880_v12 }
 0x270   : > { %v799_v17 = vpop.permute.xlu1 %798  ;;  %v802_v28 = vpop.permute.xlu0 %801 }
 0x271   : > { %v912_v51 = vrot.slane %v799_v17, %v1597_v43  ;;  %v916_v52 = vrot.slane %v802_v28, %v1597_v43 }
 0x273   : > { %v993_v3 = vsel %vm407_vm3, %v916_v52, %v912_v51 }
 0x274   : > { %v823_v29 = vpop.permute.xlu1 %822  ;;  %v826_v30 = vpop.permute.xlu0 %825 }
 0x275   : > { %v944_v53 = vrot.slane %v823_v29, %v1597_v43  ;;  %v948_v54 = vrot.slane %v826_v30, %v1597_v43 }
 0x277   : > { %v1000_v7 = vsel %vm407_vm3, %v948_v54, %v944_v53 }
 0x278   : > { %v757_v31 = vpop.permute.xlu1 %756  ;;  %v781_v32 = vpop.permute.xlu0 %780 }
 0x279   : > { %v856_v56 = vrot.slane %v757_v31, %v1597_v43  ;;  %v888_v57 = vrot.slane %v781_v32, %v1597_v43 }
 0x27b   : > { %v975_v16 = vsel %vm974_vm5, %v856_v56, %v973_v61  ;;  %v987_v18 = vsel %vm974_vm5, %v888_v57, %v986_v62 }
 0x27c   : > { %v805_v34 = vpop.permute.xlu1 %804  ;;  %v829_v35 = vpop.permute.xlu0 %828 }
 0x27d   : > { %v920_v13 = vrot.slane %v805_v34, %v1597_v43  ;;  %v952_v59 = vrot.slane %v829_v35, %v1597_v43 }
 0x27f   : > { %v994_v22 = vsel %vm974_vm5, %v920_v13, %v993_v3  ;;  %v1001_v23 = vsel %vm974_vm5, %v952_v59, %v1000_v7 }
 0x280   : > { %v760_v36 = vpop.permute.xlu1 %759  ;;  %v784_v37 = vpop.permute.xlu0 %783 }
 0x281   : > { %v860_v60 = vrot.slane %v760_v36, %v1597_v43  ;;  %v892_v63 = vrot.slane %v784_v37, %v1597_v43 }
 0x283   : > { %v977_v25 = vsel %vm976_vm6, %v860_v60, %v975_v16  ;;  %v988_v26 = vsel %vm976_vm6, %v892_v63, %v987_v18 }
 0x284   : > { %v1664_v38 = vpop.permute.xlu1 %807  ;;  %v1666_v39 = vpop.permute.xlu0 %831 }
 0x285   : > { %v924_v27 = vrot.slane %v1664_v38, %v1597_v43  ;;  %v956_v17 = vrot.slane %v1666_v39, %v1597_v43 }
 0x287   : > { %v1002_v49 = vsel %vm976_vm6, %v956_v17, %v1001_v23 }
 0x288   : > { %v763_v40 = vpop.permute.xlu1 %762  ;;  %v787_v41 = vpop.permute.xlu0 %786 }
 0x289   : > { %v864_v10 = vrot.slane %v763_v40, %v1597_v43  ;;  %v896_v11 = vrot.slane %v787_v41, %v1597_v43 }
 0x28b   : > { %v979_v29 = vsel %vm978_vm7, %v864_v10, %v977_v25  ;;  %v989_v30 = vsel %vm978_vm7, %v896_v11, %v988_v26 }
 0x28c   : > { %v1668_v33 = vpop.permute.xlu1 %810  ;;  %v1670_v42 = vpop.permute.xlu0 %834 }
 0x28d   : > { %v928_v31 = vrot.slane %v1668_v33, %v1597_v43  ;;  %v960_v32 = vrot.slane %v1670_v42, %v1597_v43 }
 0x28f   : > { %v1003_v52 = vsel %vm978_vm7, %v960_v32, %v1002_v49 }
 0x290   : > { %v766_v44 = vpop.permute.xlu1 %765  ;;  %v790_v45 = vpop.permute.xlu0 %789 }
 0x291   : > { %v868_v19 = vrot.slane %v766_v44, %v1597_v43  ;;  %v900_v20 = vrot.slane %v790_v45, %v1597_v43  ;;  %v995_v44 = vsel %vm976_vm6, %v924_v27, %v994_v22 }
 0x292   : > { %v996_v12 = vsel %vm978_vm7, %v928_v31, %v995_v44 }
 0x293   : > { %v981_v35 = vsel %vm980_vm8, %v868_v19, %v979_v29  ;;  %v990_v36 = vsel %vm980_vm8, %v900_v20, %v989_v30 }
 0x294   : > { %v1672_v46 = vpop.permute.xlu1 %813  ;;  %v1674_v47 = vpop.permute.xlu0 %837 }
 0x295   : > { %v932_v37 = vrot.slane %v1672_v46, %v1597_v43  ;;  %v964_v40 = vrot.slane %v1674_v47, %v1597_v43 }
 0x297   : > { %v997_v53 = vsel %vm980_vm8, %v932_v37, %v996_v12  ;;  %v1004_v57 = vsel %vm980_vm8, %v964_v40, %v1003_v52 }
 0x298   : > { %v769_v55 = vpop.permute.xlu1 %768  ;;  %v793_v58 = vpop.permute.xlu0 %792 }
 0x299   : > { %v872_v14 = vrot.slane %v769_v55, %v1597_v43  ;;  %v904_v28 = vrot.slane %v793_v58, %v1597_v43 }
 0x29b   : > { %v983_v42 = vsel %vm982_vm9, %v872_v14, %v981_v35  ;;  %v991_v46 = vsel %vm982_vm9, %v904_v28, %v990_v36 }
 0x29c   : > { %v817_v15 = vpop.permute.xlu1 %816  ;;  %v841_v21 = vpop.permute.xlu0 %840 }
 0x29d   : > { %v936_v41 = vrot.slane %v817_v15, %v1597_v43  ;;  %v968_v45 = vrot.slane %v841_v21, %v1597_v43 }
 0x29f   : > { %v998_v13 = vsel %vm982_vm9, %v936_v41, %v997_v53  ;;  %v1005_v60 = vsel %vm982_vm9, %v968_v45, %v1004_v57 }
 0x2a0   : > { %v772_v34 = vpop.permute.xlu1 %771  ;;  %v796_v39 = vpop.permute.xlu0 %795 }
 0x2a1   : > { %v876_v38 = vrot.slane %v772_v34, %v1597_v43  ;;  %v908_v33 = vrot.slane %v796_v39, %v1597_v43 }
 0x2a3   : > { %v985_v48 = vsel %vm984_vm10, %v876_v38, %v983_v42  ;;  %v992_v51 = vsel %vm984_vm10, %v908_v33, %v991_v46 }
 0x2a4   : > { %v820_v50 = vpop.permute.xlu1 %819  ;;  %v1012_v47 = vsel %vm1011_vm11, %v985_v48, 0.0  ;;  %v844_v55 = vpop.permute.xlu0 %843  ;;  %v1015_v56 = vsel %vm1011_vm11, %v992_v51, 0.0 }
 0x2a5   : > { %v940_v54 = vrot.slane %v820_v50, %v1597_v43  ;;  %1013 = vadd.xlane.f32.xlu1 %v1012_v47  ;;  %v972_v58 = vrot.slane %v844_v55, %v1597_v43  ;;  %1016 = vadd.xlane.f32.xlu0 %v1015_v56 }
 0x2a7   : > { %v999_v59 = vsel %vm984_vm10, %v940_v54, %v998_v13  ;;  %v1006_v62 = vsel %vm984_vm10, %v972_v58, %v1005_v60 }
 0x2a8   : > { %v1018_v61 = vsel %vm1011_vm11, %v999_v59, 0.0  ;;  %v1021_v63 = vsel %vm1011_vm11, %v1006_v62, 0.0  ;;  %v1035_v43 = vpop.permute.xlu1 %1034  ;;  %v1031_v3 = vpop.permute.xlu0 %1030 }
 0x2a9   : > { %1019 = vadd.xlane.f32.xlu0 %v1018_v61  ;;  %1022 = vadd.xlane.f32.xlu1 %v1021_v63 }
 0x2ba   : > { %1038 = vbcast.lane.b32.xlu1 %v1660_v24, 272 }
 0x2bf   : > { %1042 = vbcast.lane.b32.xlu0 %v1660_v24, 280 }
 0x32e   : > { %v1014_v7 = vpop.xlane.xlu1 %1013  ;;  %v1017_v11 = vpop.xlane.xlu0 %1016 }
 0x32f   : > { %v1048_v10 = vadd.f32 %v1031_v3, %v1014_v7  ;;  %v1049_v15 = vadd.f32 %v1035_v43, %v1017_v11 }
 0x331   : > { %v1210_v16 = vmul.f32 -1.442695, %v1048_v10  ;;  %v1211_v18 = vmul.f32 -1.442695, %v1049_v15 }
 0x332   : > { %v1023_v19 = vpop.xlane.xlu1 %1022  ;;  %v1020_v20 = vpop.xlane.xlu0 %1019 }
 0x333   : > { %1274 = vpow2.f32 %v1210_v16 }
 0x334   : > { %1276 = vpow2.f32 %v1211_v18 }
 0x336   : > { %v1039_v21 = vpop.permute.xlu1 %1038  ;;  %v1043_v22 = vpop.permute.xlu0 %1042 }
 0x337   : > { %v1050_v23 = vadd.f32 %v1039_v21, %v1020_v20  ;;  %v1051_v25 = vadd.f32 %v1043_v22, %v1023_v19 }
 0x339   : > { %v1212_v14 = vmul.f32 -1.442695, %v1050_v23  ;;  %v1213_v26 = vmul.f32 -1.442695, %v1051_v25 }
 0x33b   : > { %1278 = vpow2.f32 %v1212_v14 }
 0x33c   : > { %1280 = vpow2.f32 %v1213_v26 }
 0x340   : > { %v1275_v24 = vpop.eup %1274 }
 0x341   : > { %v1277_v27 = vpop.eup %1276  ;;  %v1064_v17 = vadd.f32 1.0, %v1275_v24 }
 0x342   : > { %v1065_v28 = vadd.f32 1.0, %v1277_v27 }
 0x343   : > { %1282 = vrcp.f32 %v1064_v17 }
 0x344   : > { %1284 = vrcp.f32 %v1065_v28 }
 0x348   : > { %v1279_v29 = vpop.eup %1278 }
 0x349   : > { %v1281_v30 = vpop.eup %1280  ;;  %v1066_v31 = vadd.f32 1.0, %v1279_v29 }
 0x34a   : > { %v1067_v32 = vadd.f32 1.0, %v1281_v30 }
 0x34b   : > { %1286 = vrcp.f32 %v1066_v31 }
 0x34c   : > { %1288 = vrcp.f32 %v1067_v32 }
 0x350   : > { %v1283_v34 = vpop.eup %1282 }
 0x351   : > { %v1285_v35 = vpop.eup %1284  ;;  %1078 = vperm.xlu1 %1273, %v1283_v34  }
 0x352   : > { %1083 = vperm.xlu0 %1272, %v1285_v35  }
 0x358   : > { %v1287_v36 = vpop.eup %1286 }
 0x359   : > { %v1289_v37 = vpop.eup %1288  ;;  %1088 = vperm.xlu1 %1273, %v1287_v36  }
 0x35a   : > { %1093 = vperm.xlu0 %1272, %v1289_v37  }
 0x3cc   : > { %v1079_v38 = vpop.permute.xlu1 %1078 }
 0x3cd   : > { %v1096_v39 = vmul.f32 %v1079_v38, %v1532_v2  ;;  %v1097_v40 = vmul.f32 %v1079_v38, %v1536_v4  ;;  %v1084_v41 = vpop.permute.xlu0 %1083 }
 0x3ce   : > { %v1098_v33 = vmul.f32 %v1084_v41, %v1544_v8  ;;  %v1099_v42 = vmul.f32 %v1084_v41, %v1546_v9 }
 0x3cf   : > { %1104 = vst [vmem:[%s242_s29] sm:$0xff] %v1096_v39  ;;  %1105 = vst [vmem:[%s242_s29 + $0x8] sm:$0xff] %v1097_v40 }
 0x3d0   : > { %1106 = vst [vmem:[%s242_s29 + $0x10] sm:$0xff] %v1098_v33  ;;  %1107 = vst [vmem:[%s242_s29 + $0x18] sm:$0xff] %v1099_v42 }
 0x3d4   : > { %v1089_v2 = vpop.permute.xlu1 %1088 }
 0x3d5   : > { %v1100_v4 = vmul.f32 %v1089_v2, %v1528_v0  ;;  %v1101_v8 = vmul.f32 %v1089_v2, %v1530_v1  ;;  %v1094_v9 = vpop.permute.xlu0 %1093 }
 0x3d6   : > { %v1102_v44 = vmul.f32 %v1094_v9, %v1538_v5  ;;  %v1103_v45 = vmul.f32 %v1094_v9, %v1540_v6 }
 0x3d7   : > { %1108 = vst [vmem:[%s242_s29 + $0x20] sm:$0xff] %v1100_v4  ;;  %1109 = vst [vmem:[%s242_s29 + $0x28] sm:$0xff] %v1101_v8 }
 0x3d8   : > { %1110 = vst [vmem:[%s242_s29 + $0x30] sm:$0xff] %v1102_v44  ;;  %1111 = vst [vmem:[%s242_s29 + $0x38] sm:$0xff] %v1103_v45 }
 0x3d9   : > { %1331 = shalt.err (!%p1328_p10)
}
 0x3da   : > { %s1332_s11 = scalar_lea.hbm %s1762_s16, 1024  ;;  %s1336_s26 = scalar_lea.hbm %s1812_s5, 2048 }
 0x3db   : > { %p1333_p0 = scmp.ne.s32.totalorder %s1762_s16, %s1332_s11  ;;  %p1337_p1 = scmp.lt.s32.totalorder %s1762_s16, %s1812_s5 }
 0x3dc   : > { %p1338_p3 = scmp.lt.s32.totalorder %s1336_s26, %s1332_s11 }
 0x3dd   : > { %p1334_p2 = pnand %p1333_p0, %p1821_p12 }
 0x3de   : > { %p1339_p6 = por %p1338_p3, %p1337_p1 }
 0x3df   : > { %p1335_p9 = pneg %p1334_p2 }
 0x3e1   : > { %p1340_p11 = pnand %p1339_p6, %p1335_p9 }
 0x3e3   : > { %1343 = shalt.err (!%p1340_p11)
}
 0x3e4   : > { %s1389_s14 = smov 256   ;;  %s1390_s15 = smov 16  }
 0x3e5   : > { %1223 = dma.vmem_to_hbm [thread:$0]  (%p1821_p12), %s1755_s12, 1024, %s1762_s16, %s1113_s22, %s1389_s14, %s1389_s14, %s1390_s15  }
 0x3e6 PF: > { %s1141_s25 = sand.u32 1, %s1370_s18   ;;  %p1822_p13 = scmp.ne.s32.totalorder %s1818_s6, 0 }
 0x3e7   : > { %p1823_p4 = scmp.ge.s32.totalorder %s1382_s21, 2  ;;  %s1142_s8 = scalar_lea.sflag [#allocation4], %s1141_s25 }
 0x3e9   : > { %p1230_p5 = pnand %p1823_p4, %p1822_p13 }
 0x3eb   : > { %p1231_p7 = pneg %p1230_p5 }
 0x3ed   : > { %1365 = dma.done.wait (%p1231_p7), %s1142_s8, 1024  }
 0x3ee   : > { %1367 = vsyncadd (%p1231_p7), %s1142_s8, 4294966272  ;;  %p18_p8 = scmp.ge.s32.totalorder %s1446_s24, 4   ;;  %s1824_s18 = smov %s1374_s19 }
 0x3ef   : > { %s1825_s19 = smov %s1378_s20  ;;  %s1826_s20 = smov %s1458_s27 }
 0x3f0   : > { %s1827_s21 = smov %s1446_s24  ;;  %20 = sbr.rel (!%p18_p8) target bundleno = 5 (0x5), region = 85 }
 0x3f5   :  { %1147 = vsyncpa [#allocation3], 1 }
 0x3f6   :  { %1149 = vsyncpa [#allocation3 + $0x1], 1 }
 0x3f7   :  { %1150 = vsyncpa [#allocation4], 1 }
 0x3f8   :  { %1152 = vsyncpa [#allocation4 + $0x1], 1 }

</bundles_post_ra>
